<compile_context>
chip_gen: v6e
topology: v6e:2x2x1
jax: 0.10.0
libtpu: 0.0.40
codegen_flags: <defaults>
</compile_context>

<pallas_src>
import functools

import jax
import jax.numpy as jnp
from jax.experimental import pallas as pl
from jax.experimental.pallas import tpu as pltpu


def _down_kernel(p_ref, w_ref, prm_ref, o_ref, *, eps):
    # p_ref:   (1, 9*Cin, P) bf16  -- transposed im2col of the pooled input (P lane-dense)
    # w_ref:   (Cout, 9*Cin) bf16  -- conv weight, K ordered (ky, kx, cin)
    # prm_ref: (Cout, 3+Cout) f32  -- [bias | gamma | beta | group-averaging matrix]
    # o_ref:   (1, Cout, P)   f32
    patches = p_ref[0]                                   # (K, P) bf16
    w_t = w_ref[...]                                     # (Cout, K) bf16
    prm = prm_ref[...]                                   # (Cout, 3+Cout) f32

    bias = prm[:, 0:1]                                   # (Cout, 1)
    gamma = prm[:, 1:2]
    beta = prm[:, 2:3]
    gavg = prm[:, 3:]                                    # (Cout, Cout) group-averaging

    # Conv2d(3x3, padding=1) of the pooled input as ONE bf16 MXU matmul, f32 accumulate.
    y = jnp.dot(w_t, patches, preferred_element_type=jnp.float32) + bias   # (Cout, P) f32

    # GroupNorm(num_groups): per-channel E[y], E[y^2] (shared within a group) via the
    # precomputed averaging matrix -> two tiny MXU dots, no transposes in-kernel.
    s = jnp.sum(y, axis=1, keepdims=True)                # (Cout, 1)
    ss = jnp.sum(y * y, axis=1, keepdims=True)           # (Cout, 1)
    mean_c = jnp.dot(gavg, s, preferred_element_type=jnp.float32)      # (Cout, 1)
    meansq_c = jnp.dot(gavg, ss, preferred_element_type=jnp.float32)   # (Cout, 1)
    var_c = jnp.maximum(meansq_c - mean_c * mean_c, 0.0)  # clamp: cancellation guard
    scale = jax.lax.rsqrt(var_c + eps) * gamma

    y = (y - mean_c) * scale + beta
    # ReLU + lane-dense store (Cout rows, P lanes).
    o_ref[0] = jnp.maximum(y, 0.0).astype(o_ref.dtype)


def down_forward(x, w_conv, b_conv, gamma, beta, *, num_groups, eps=1e-5):
    """x: (N, Cin, H, W) float32 (NCHW). Returns (N, Cout, H//2, W//2) float32."""
    N, Cin, H, W = x.shape
    Cout = w_conv.shape[0]
    H2, W2 = H // 2, W // 2
    P = H2 * W2
    K = 9 * Cin

    # --- MaxPool2d(2) in the wrapper (floor semantics: crop any odd tail like PyTorch) ---
    xc = x[:, :, :2 * H2, :2 * W2]
    pooled = jnp.maximum(
        jnp.maximum(xc[:, :, 0::2, 0::2], xc[:, :, 0::2, 1::2]),
        jnp.maximum(xc[:, :, 1::2, 0::2], xc[:, :, 1::2, 1::2]))          # (N, Cin, H2, W2)

    # --- transposed im2col of the POOLED input: (N, 9*Cin, P), P lane-dense, bf16 ---
    xp = jnp.pad(pooled, ((0, 0), (0, 0), (1, 1), (1, 1)))                # zero pad=1
    cols = [xp[:, :, ky:ky + H2, kx:kx + W2].reshape(N, Cin, P)
            for ky in range(3) for kx in range(3)]
    patches = jnp.concatenate(cols, axis=1).astype(jnp.bfloat16)          # (N, K, P)

    # Conv weight (Cout, Cin, 3, 3) -> (Cout, 9*Cin) matching the (ky, kx, cin) K order.
    w_t = jnp.transpose(w_conv, (0, 2, 3, 1)).reshape(Cout, K).astype(jnp.bfloat16)

    # Packed per-channel params: [bias | gamma | beta | group-averaging matrix].
    cpg = Cout // num_groups
    gid = jnp.arange(Cout) // cpg
    gavg = (gid[:, None] == gid[None, :]).astype(jnp.float32) / float(P * cpg)
    prm = jnp.concatenate(
        [b_conv.reshape(Cout, 1), gamma.reshape(Cout, 1),
         beta.reshape(Cout, 1), gavg], axis=1).astype(jnp.float32)        # (Cout, 3+Cout)

    kernel = functools.partial(_down_kernel, eps=eps)

    out = pl.pallas_call(
        kernel,
        out_shape=jax.ShapeDtypeStruct((N, Cout, P), jnp.float32),
        grid_spec=pltpu.PrefetchScalarGridSpec(
            num_scalar_prefetch=0,
            grid=(N,),
            in_specs=[pl.BlockSpec((1, K, P), lambda n: (n, 0, 0)),
                      pl.BlockSpec((Cout, K), lambda n: (0, 0)),
                      pl.BlockSpec((Cout, 3 + Cout), lambda n: (0, 0))],
            out_specs=pl.BlockSpec((1, Cout, P), lambda n: (n, 0, 0)),
        ),
        compiler_params=pltpu.CompilerParams(
            dimension_semantics=("parallel",)),   # samples independent -> v7x 2-TC split
    )(patches, w_t, prm)

    # (N, Cout, P) is already NCHW-ordered: pure reshape, no transpose / extra HBM pass.
    return out.reshape(N, Cout, H2, W2)


def down_reference(x, w_conv, b_conv, gamma, beta, num_groups, eps=1e-5):
    """Pure-JAX reference mirroring the PyTorch module (f32 end-to-end)."""
    xp = jax.lax.reduce_window(x, -jnp.inf, jax.lax.max,
                               (1, 1, 2, 2), (1, 1, 2, 2), 'VALID')
    y = jax.lax.conv_general_dilated(
        xp, w_conv, window_strides=(1, 1), padding=((1, 1), (1, 1)),
        dimension_numbers=('NCHW', 'OIHW', 'NCHW'),
        preferred_element_type=jnp.float32)
    y = y + b_conv[None, :, None, None]
    N, C, Hh, Ww = y.shape
    yg = y.reshape(N, num_groups, C // num_groups, Hh, Ww)
    mu = yg.mean(axis=(2, 3, 4), keepdims=True)
    var = ((yg - mu) ** 2).mean(axis=(2, 3, 4), keepdims=True)
    yn = ((yg - mu) * jax.lax.rsqrt(var + eps)).reshape(N, C, Hh, Ww)
    return jax.nn.relu(yn * gamma[None, :, None, None] + beta[None, :, None, None])


if __name__ == "__main__":
    key = jax.random.PRNGKey(0)
    k1, k2, k3, k4, k5 = jax.random.split(key, 5)

    # Down(in_channels=4, out_channels=8) => GroupNorm(4, 8) since mid_channels != 1.
    N, Cin, H, W = 2, 4, 16, 16
    Cout = 8
    G = 4

    x = jax.random.normal(k1, (N, Cin, H, W), dtype=jnp.float32)
    w_conv = 0.1 * jax.random.normal(k2, (Cout, Cin, 3, 3), dtype=jnp.float32)
    b_conv = 0.1 * jax.random.normal(k3, (Cout,), dtype=jnp.float32)
    gamma = 1.0 + 0.1 * jax.random.normal(k4, (Cout,), dtype=jnp.float32)
    beta = 0.1 * jax.random.normal(k5, (Cout,), dtype=jnp.float32)

    out = down_forward(x, w_conv, b_conv, gamma, beta, num_groups=G)
    out = jax.block_until_ready(out)

    ref = down_reference(x, w_conv, b_conv, gamma, beta, G)
    assert out.shape == (N, Cout, H // 2, W // 2), out.shape
    max_err = float(jnp.max(jnp.abs(out - ref)))
    # bf16 matmul operands (f32 accumulation) -> tolerance relaxed vs. pure-f32 path.
    assert max_err < 1e-1, f"max abs err too large: {max_err}"

    print("KERNEL_OK")
</pallas_src>

<mosaic_0001>
module attributes {stable_mosaic.version = 11 : i64} {
  func.func @_down_kernel(%arg0: i32, %arg1: memref<1x36x64xbf16, #tpu.memory_space<vmem>>, %arg2: memref<8x36xbf16, #tpu.memory_space<vmem>>, %arg3: memref<8x11xf32, #tpu.memory_space<vmem>>, %arg4: memref<1x8x64xf32, #tpu.memory_space<vmem>>) attributes {dimension_semantics = [#tpu.dimension_semantics<parallel>], iteration_bounds = array<i64: 2>, scalar_prefetch = 0 : i64, scratch_operands = 0 : i64, tpu.core_type = #tpu.core_type<tc>, window_params = [{transform_indices = @transform_0, window_bounds = array<i64: 1, 36, 64>}, {pipeline_mode = #tpu.pipeline_mode<synchronous>, transform_indices = @transform_1, window_bounds = array<i64: 8, 36>}, {pipeline_mode = #tpu.pipeline_mode<synchronous>, transform_indices = @transform_2, window_bounds = array<i64: 8, 11>}, {transform_indices = @transform_3, window_bounds = array<i64: 1, 8, 64>}]} {
    %c0 = arith.constant 0 : index
    %c0_0 = arith.constant 0 : index
    %c0_1 = arith.constant 0 : index
    %0 = vector.load %arg1[%c0, %c0_0, %c0_1] : memref<1x36x64xbf16, #tpu.memory_space<vmem>>, vector<1x36x64xbf16>
    %1 = vector.shape_cast %0 : vector<1x36x64xbf16> to vector<36x64xbf16>
    %c0_2 = arith.constant 0 : index
    %c0_3 = arith.constant 0 : index
    %2 = vector.load %arg2[%c0_2, %c0_3] : memref<8x36xbf16, #tpu.memory_space<vmem>>, vector<8x36xbf16>
    %c0_4 = arith.constant 0 : index
    %c0_5 = arith.constant 0 : index
    %3 = vector.load %arg3[%c0_4, %c0_5] : memref<8x11xf32, #tpu.memory_space<vmem>>, vector<8x11xf32>
    %4 = vector.extract_strided_slice %3 {offsets = [0, 0], sizes = [8, 1], strides = [1, 1]} : vector<8x11xf32> to vector<8x1xf32>
    %5 = vector.extract_strided_slice %3 {offsets = [0, 1], sizes = [8, 1], strides = [1, 1]} : vector<8x11xf32> to vector<8x1xf32>
    %6 = vector.extract_strided_slice %3 {offsets = [0, 2], sizes = [8, 1], strides = [1, 1]} : vector<8x11xf32> to vector<8x1xf32>
    %7 = vector.extract_strided_slice %3 {offsets = [0, 3], sizes = [8, 8], strides = [1, 1]} : vector<8x11xf32> to vector<8x8xf32>
    %cst = arith.constant dense<0.000000e+00> : vector<8x64xf32>
    %8 = tpu.matmul %2, %1, %cst {dimension_numbers = #tpu.dot_dimension_numbers<[1], [0], [0], [1], [0, 0, 1, 1], [], []>} : vector<8x36xbf16>, vector<36x64xbf16>, vector<8x64xf32> -> vector<8x64xf32>
    %9 = vector.broadcast %4 : vector<8x1xf32> to vector<8x64xf32>
    %10 = arith.addf %8, %9 : vector<8x64xf32>
    %cst_6 = arith.constant dense<0.000000e+00> : vector<8xf32>
    %11 = vector.multi_reduction <add>, %10, %cst_6 [1] : vector<8x64xf32> to vector<8xf32>
    %12 = vector.shape_cast %11 : vector<8xf32> to vector<8x1xf32>
    %13 = arith.mulf %10, %10 : vector<8x64xf32>
    %cst_7 = arith.constant dense<0.000000e+00> : vector<8xf32>
    %14 = vector.multi_reduction <add>, %13, %cst_7 [1] : vector<8x64xf32> to vector<8xf32>
    %15 = vector.shape_cast %14 : vector<8xf32> to vector<8x1xf32>
    %cst_8 = arith.constant dense<0.000000e+00> : vector<8x1xf32>
    %16 = tpu.matmul %7, %12, %cst_8 {dimension_numbers = #tpu.dot_dimension_numbers<[1], [0], [0], [1], [0, 0, 1, 1], [], []>} : vector<8x8xf32>, vector<8x1xf32>, vector<8x1xf32> -> vector<8x1xf32>
    %cst_9 = arith.constant dense<0.000000e+00> : vector<8x1xf32>
    %17 = tpu.matmul %7, %15, %cst_9 {dimension_numbers = #tpu.dot_dimension_numbers<[1], [0], [0], [1], [0, 0, 1, 1], [], []>} : vector<8x8xf32>, vector<8x1xf32>, vector<8x1xf32> -> vector<8x1xf32>
    %18 = arith.mulf %16, %16 : vector<8x1xf32>
    %19 = arith.subf %17, %18 : vector<8x1xf32>
    %cst_10 = arith.constant 0.000000e+00 : f32
    %20 = vector.broadcast %cst_10 : f32 to vector<8x1xf32>
    %21 = arith.maximumf %19, %20 : vector<8x1xf32>
    %cst_11 = arith.constant 9.99999974E-6 : f32
    %22 = vector.broadcast %cst_11 : f32 to vector<8x1xf32>
    %23 = arith.addf %21, %22 : vector<8x1xf32>
    %24 = math.rsqrt %23 : vector<8x1xf32>
    %25 = arith.mulf %24, %5 : vector<8x1xf32>
    %26 = vector.broadcast %16 : vector<8x1xf32> to vector<8x64xf32>
    %27 = arith.subf %10, %26 : vector<8x64xf32>
    %28 = vector.broadcast %25 : vector<8x1xf32> to vector<8x64xf32>
    %29 = arith.mulf %27, %28 : vector<8x64xf32>
    %30 = vector.broadcast %6 : vector<8x1xf32> to vector<8x64xf32>
    %31 = arith.addf %29, %30 : vector<8x64xf32>
    %cst_12 = arith.constant 0.000000e+00 : f32
    %32 = vector.broadcast %cst_12 : f32 to vector<8x64xf32>
    %33 = arith.maximumf %31, %32 : vector<8x64xf32>
    %c0_13 = arith.constant 0 : index
    %c0_14 = arith.constant 0 : index
    %c0_15 = arith.constant 0 : index
    %34 = vector.load %arg4[%c0_13, %c0_14, %c0_15] : memref<1x8x64xf32, #tpu.memory_space<vmem>>, vector<1x8x64xf32>
    %35 = vector.shape_cast %34 : vector<1x8x64xf32> to vector<8x64xf32>
    %36 = vector.shape_cast %33 : vector<8x64xf32> to vector<1x8x64xf32>
    tpu.vector_store %arg4[%c0_13, %c0_14, %c0_15], %36 {strides = array<i32>} : memref<1x8x64xf32, #tpu.memory_space<vmem>>, vector<1x8x64xf32>,
    return
  }
  func.func @transform_0(%arg0: i32) -> (i32, i32, i32) {
    %c0_i32 = arith.constant 0 : i32
    %c0_i32_0 = arith.constant 0 : i32
    %c0_i32_1 = arith.constant 0 : i32
    return %arg0, %c0_i32, %c0_i32_0 : i32, i32, i32
  }
  func.func @transform_1(%arg0: i32) -> (i32, i32) {
    %c0_i32 = arith.constant 0 : i32
    %c0_i32_0 = arith.constant 0 : i32
    %c0_i32_1 = arith.constant 0 : i32
    return %c0_i32, %c0_i32_0 : i32, i32
  }
  func.func @transform_2(%arg0: i32) -> (i32, i32) {
    %c0_i32 = arith.constant 0 : i32
    %c0_i32_0 = arith.constant 0 : i32
    %c0_i32_1 = arith.constant 0 : i32
    return %c0_i32, %c0_i32_0 : i32, i32
  }
  func.func @transform_3(%arg0: i32) -> (i32, i32, i32) {
    %c0_i32 = arith.constant 0 : i32
    %c0_i32_0 = arith.constant 0 : i32
    %c0_i32_1 = arith.constant 0 : i32
    return %arg0, %c0_i32, %c0_i32_0 : i32, i32, i32
  }
}

</mosaic_0001>

<bundles_post_ra>
// kernel: tpu_custom_call.1
= control target key start
LH: loop header
LB: loop body
LE: loop exit
PB: predicated region body
PF: predicated region fallthrough
CT: control target
= control target key end

     0   :  { %8 = vsyncpa [#allocation3], 0  ;;  %s792_s0 = inlined_call_operand.vmem [shape: bf16[2,36,64], index: 0, kind: input, shape index: {}]   ;;  %s793_s1 = inlined_call_operand.vmem [shape: bf16[8,36], index: 1, kind: input, shape index: {}]   ;;  %s794_s2 = inlined_call_operand.vmem [shape: f32[8,11], index: 2, kind: input, shape index: {}]   ;;  %s795_s3 = inlined_call_operand.hbm [shape: f32[2,8,64], index: 3, kind: output, shape index: {}]  }
   0x1   :  { %10 = vsyncpa [#allocation3 + $0x1], 0  ;;  %s687_s12 = smov 0   ;;  %s689_s13 = smov 0  }
   0x2   :  { %s691_s14 = smov 0   ;;  %s693_s15 = smov 0  }
   0x3 LB: > { %s708_s16 = sadd.s32 4294967295, %s658_s15   ;;  %s499_s17 = sadd.s32 4294967294, %s658_s15   ;;  %s658_s15 = sphi %s693_s15, %s801_s15   ;;  %s654_s14 = sphi %s691_s14, %s800_s14   ;;  %s650_s13 = sphi %s689_s13, %s799_s13   ;;  %s646_s12 = sphi %s687_s12, %s798_s12  }
   0x4   : > { %s712_s18 = sadd.s32 1, %s658_s15   ;;  %s91_s19 = sadd.s32 1, %s654_s14 }
   0x5   : > { %s88_s20 = ssub.s32 %s658_s15, %s712_s18  ;;  %p101_p0 = scmp.ne.s32.totalorder %s654_s14, %s650_s13 }
   0x6   : > { %p89_p1 = scmp.eq.s32.totalorder %s88_s20, 0  ;;  %p102_p2 = scmp.eq.s32.totalorder %s708_s16, 1 }
   0x7   : > { %p107_p3 = scmp.ne.s32.totalorder %s650_s13, %s646_s12  ;;  %p108_p4 = scmp.eq.s32.totalorder %s499_s17, 1 }
   0x8   : > { %s723_s21 = scalar_select %p89_p1, %s654_s14, %s91_s19  }
   0x9   : > { %p725_p5 = por %p102_p2, %p101_p0  ;;  %p729_p6 = por %p108_p4, %p107_p3 }
   0xa   : > { %p502_p7 = scmp.ge.s32.totalorder %s658_s15, 1  ;;  %p140_p8 = scmp.lt.s32.totalorder %s658_s15, 3 }
   0xc   : > { %p141_p9 = pnand %p502_p7, %p140_p8 }
   0xd   : > { %p164_p10 = scmp.lt.s32.totalorder (!%p141_p9), %s708_s16, 1  ;;  %s663_s6 = smov (!%p141_p9), 125  }
   0xe   : > { %144 = sbr.rel (%p141_p9) target bundleno = 742 (0x2e6), region = 32  ;;  %s664_s7 = smov (!%p141_p9), 127  }
   0xf   : > { %s161_s8 = sand.u32 (!%p141_p9), 1, %s650_s13   ;;  %s512_s10 = sshll.u32 (!%p141_p9), %s708_s16, 7 }
  0x10   : > { %s503_s9 = sshll.u32 (!%p141_p9), %s161_s8, 3  ;;  %s438_s24 = scalar_lea.hbm (!%p141_p9), %s795_s3, %s512_s10 }
  0x11   : > { %s163_s11 = scalar_lea.vmem (!%p141_p9), [#allocation2], %s503_s9  ;;  %s427_s25 = scalar_lea.sflag (!%p141_p9), [#allocation3], %s161_s8 }
  0x12   : > { %s440_s17 = sshll.u32 (!%p141_p9), %s163_s11, 4  ;;  %s441_s17 = int_to_ptr.vmem [resolvable:$true] %s440_s17 }
  0x13   : > { %v660_v0 = vmov 0.0   ;;  %vm661_vm0 = vmmov 0   ;;  %v740_v1 = vld [vmem:[%s794_s2] sm:$0xff]  ;;  %s165_s26 = scalar_select %p164_p10, %s708_s16, 1  ;;  %v662_v2 = vmov 0   ;;  %vm201_vm1 = vcmask 1041408  }
  0x14   : > { %523 = vmatprep.subr.bf16.mxu0 %v660_v0  ;;  %529 = vmatprep.mubr.msk.bf16.mxu0 %vm661_vm0, %v660_v0  ;;  %v175_v7 = vld [vmem:[%s793_s1] sm:$0xf]  ;;  %vm197_vm2 = vcmask 293888   ;;  %vm245_vm3 = vcmask 523264   ;;  %vm255_vm4 = vcmask 64512   ;;  %v665_v20 = vmov 2  }
  0x15   : > { %589 = vset.pattern.permute.xlu0 %v662_v2  ;;  %533 = vmatprep.subr.mxu1 %v660_v0  ;;  %s543_s27 = smul.u32 20, %s165_s26  ;;  %s598_s26 = scalar_lea.vmem %s441_s17, 128 }
  0x16   : > { %179 = vperm.xlu0 %589, %v740_v1   ;;  %535 = vmatprep.mubr.msk.f32.mxu1 %vm661_vm0, %v660_v0  ;;  %p599_p11 = scmp.ne.s32.totalorder %s441_s17, %s598_s26 }
  0x17   : > { %590 = vset.pattern.permute.xlu1 %v662_v2  ;;  %s168_s30 = scalar_lea.vmem %s792_s0, %s543_s27  ;;  %s666_s27 = smov [#allocation2]  }
  0x18   : > { %v593_v3 = vld [vmem:[%s168_s30 + $0x10] ss:$0 sps:$4 sm:$0x33]   ;;  %v594_v5 = vld [vmem:[%s168_s30 + $0x8] sm:$0xff]   ;;  %v595_v6 = vld [vmem:[%s168_s30] sm:$0xff]   ;;  %p600_p12 = pnand %p599_p11, %p725_p5  ;;  %s602_s28 = sshll.u32 %s666_s27, 4  ;;  %s603_s28 = int_to_ptr.vmem [resolvable:$false] %s602_s28 }
  0x19   : > { %v203_v4 = vsel %vm201_vm1, %v593_v3, 0  ;;  %s604_s16 = scalar_lea.vmem %s603_s28, 256  ;;  %p605_p0 = scmp.lt.s32.totalorder %s441_s17, %s603_s28 }
  0x1a   : > { %524 = vmatpush3.bf16.msra.mxu0 %v203_v4  ;;  %592 = vset.pattern.permute.xlu0 %v665_v20  ;;  %p601_p13 = pneg %p600_p12  ;;  %p606_p1 = scmp.lt.s32.totalorder %s604_s16, %s598_s26 }
  0x1b   : > { %525 = vmatprep.subr.bf16.mxu0 %v660_v0 }
  0x1c   : > { %p607_p2 = por %p606_p1, %p605_p0 }
  0x1e   : > { %526 = vmatpush3.bf16.msra.mxu0 %v594_v5  ;;  %p608_p3 = pnand %p607_p2, %p601_p13 }
  0x1f   : > { %527 = vmatprep.subr.bf16.mxu0 %v660_v0 }
  0x22   : > { %528 = vmatpush3.bf16.msra.mxu0 %v595_v6 }
  0x25   : > { %530 = vmatmul.mubr.msk.bf16.vlgmr.msra.gmra.mxu0 %vm197_vm2, %v175_v7 }
  0x91   : > { %v180_v8 = vpop.permute.xlu0 %179 }
  0xe5   : > { %v239_v9 = vpop.f32.mrf.mxu0 }
  0xe6   : > { %v240_v10 = vadd.f32 %v239_v9, %v180_v8 }
  0xe7   : > { %v531_v11 = vpop.f32.mrf.mxu0 }
  0xe8   : > { %v246_v12 = vsel %vm245_vm3, %v240_v10, 0.0  ;;  %v249_v13 = vmul.f32 %v240_v10, %v240_v10 }
  0xe9   : > { %247 = vadd.xlane.f32.xlu0 %v246_v12  ;;  %v242_v14 = vpop.f32.mrf.mxu0 }
  0xea   : > { %v250_v15 = vsel %vm245_vm3, %v249_v13, 0.0 }
  0xeb   : > { %251 = vadd.xlane.f32.xlu1 %v250_v15  ;;  %v532_v16 = vpop.f32.mrf.mxu0 }
  0xfc   : > { %253 = vrot.lane.b32.xlu1 %v740_v1, %s663_s6 }
 0x100   : > { %403 = vrot.lane.b32.xlu1 %v740_v1, %s664_s7 }
 0x172   : > { %v248_v17 = vpop.xlane.xlu0 %247 }
 0x173   : > { %534 = vmatpush3.msra.mxu1 %v248_v17 }
 0x174   : > { %v252_v18 = vpop.xlane.xlu1 %251  ;;  %538 = vmatprep.subr.mxu1 %v660_v0 }
 0x178   : > { %v254_v19 = vpop.permute.xlu1 %253 }
 0x179   : > { %536 = vmatmul.mubr.msk.f32.vlgmr.msra.gmra.mxu1 %vm255_vm4, %v254_v19 }
 0x17a   : > { %539 = vmatpush3.msra.mxu1 %v252_v18  ;;  %540 = vmatprep.mubr.msk.f32.mxu1 %vm661_vm0, %v660_v0 }
 0x17c   : > { %v404_v29 = vpop.permute.xlu1 %403 }
 0x17d   : > { %541 = vmatmul.mubr.msk.f32.vlgmr.msra.gmra.mxu1 %vm255_vm4, %v254_v19 }
 0x239   : > { %v324_v21 = vpop.f32.mrf.mxu1 }
 0x23a   : > { %409 = vperm.xlu1 %590, %v324_v21   ;;  %v398_v23 = vmul.f32 %v324_v21, %v324_v21 }
 0x23b   : > { %v537_v22 = vpop.f32.mrf.mxu1 }
 0x23d   : > { %v394_v24 = vpop.f32.mrf.mxu1 }
 0x23e   : > { %v399_v25 = vsub.f32 %v394_v24, %v398_v23 }
 0x23f   : > { %v542_v26 = vpop.f32.mrf.mxu1 }
 0x240   : > { %v400_v27 = vmax.f32 %v399_v25, 0.0 }
 0x242   : > { %v401_v28 = vadd.f32 1e-05, %v400_v27 }
 0x244   : > { %596 = vrsqrt.f32 %v401_v28 }
 0x251   : > { %v597_v30 = vpop.eup %596 }
 0x252   : > { %v406_v31 = vmul.f32 %v597_v30, %v404_v29 }
 0x254   : > { %415 = vperm.xlu1 %590, %v406_v31  }
 0x258   : > { %591 = vset.pattern.permute.xlu1 %v665_v20 }
 0x259   : > { %420 = vperm.xlu1 %591, %v740_v1  }
 0x2b5   : > { %v410_v32 = vpop.permute.xlu1 %409 }
 0x2b6   : > { %v412_v34 = vsub.f32 %v240_v10, %v410_v32 }
 0x2cf   : > { %v416_v33 = vpop.permute.xlu1 %415 }
 0x2d0   : > { %v418_v35 = vmul.f32 %v416_v33, %v412_v34 }
 0x2d4   : > { %v421_v36 = vpop.permute.xlu1 %420 }
 0x2d5   : > { %v423_v37 = vadd.f32 %v421_v36, %v418_v35 }
 0x2d7   : > { %v424_v38 = vmax.f32 %v423_v37, 0.0 }
 0x2d9   : > { %425 = vst.msk [vmem:[%s163_s11] sm:$0xff] %vm245_vm3, %v424_v38 }
 0x2da   : > { %611 = shalt.err (!%p608_p3)
}
 0x2db   : > { %s612_s29 = scalar_lea.hbm %s438_s24, 128  ;;  %s616_s5 = scalar_lea.hbm %s795_s3, 256 }
 0x2dc   : > { %p613_p4 = scmp.ne.s32.totalorder %s438_s24, %s612_s29  ;;  %p617_p9 = scmp.lt.s32.totalorder %s438_s24, %s795_s3 }
 0x2dd   : > { %p618_p10 = scmp.lt.s32.totalorder %s616_s5, %s612_s29 }
 0x2de   : > { %p614_p7 = pnand %p613_p4, %p725_p5 }
 0x2df   : > { %p619_p11 = por %p618_p10, %p617_p9 }
 0x2e0   : > { %p615_p8 = pneg %p614_p7 }
 0x2e2   : > { %p620_p12 = pnand %p619_p11, %p615_p8 }
 0x2e4   : > { %623 = shalt.err (!%p620_p12)
}
 0x2e5   : > { %544 = dma.vmem_to_hbm [thread:$0]  (%p725_p5), %s441_s17, 128, %s438_s24, %s427_s25  }
 0x2e6 PF: > { %p550_p13 = scmp.ge.s32.totalorder %s658_s15, 2  ;;  %s452_s8 = sand.u32 1, %s646_s12  }
 0x2e7   : > { %s453_s9 = scalar_lea.sflag [#allocation3], %s452_s8 }
 0x2e8   : > { %p547_p0 = pnand %p550_p13, %p729_p6 }
 0x2ea   : > { %p548_p1 = pneg %p547_p0 }
 0x2ec   : > { %641 = dma.done.wait (%p548_p1), %s453_s9, 128  }
 0x2ed   : > { %643 = vsyncadd (%p548_p1), %s453_s9, 4294967168  ;;  %p13_p2 = scmp.ge.s32.totalorder %s712_s18, 4   ;;  %s798_s12 = smov %s650_s13 }
 0x2ee   : > { %s799_s13 = smov %s654_s14  ;;  %s800_s14 = smov %s723_s21 }
 0x2ef   : > { %s801_s15 = smov %s712_s18  ;;  %15 = sbr.rel (!%p13_p2) target bundleno = 3 (0x3), region = 67 }
 0x2f4   :  { %458 = vsyncpa [#allocation3], 1 }
 0x2f5   :  { %460 = vsyncpa [#allocation3 + $0x1], 1 }

</bundles_post_ra>
